<compile_context>
chip_gen: v7x
topology: tpu7x:2x2x1
jax: 0.10.0
libtpu: 0.0.40
codegen_flags: <defaults>
</compile_context>

<pallas_src>
import jax
import jax.numpy as jnp
from jax.experimental import pallas as pl
from jax.experimental.pallas import tpu as pltpu

KW = 7  # taps of Conv2d(1, 1, (1, 7))  -> slides along W
KH = 7  # taps of Conv2d(1, 1, (7, 1))  -> slides along H

_MIB = 1024 * 1024


def _round_up(x, m):
    return ((x + m - 1) // m) * m


def _vmem_config():
    """(vmem ceiling bytes, prefer >=2 grid steps) by TPU generation."""
    try:
        kind = jax.devices()[0].device_kind.lower()
    except Exception:
        kind = ""
    is_v7 = ("tpu" in kind) and ("7" in kind)          # v7x: 64 MiB VMEM, 2 TCs
    known_big = any(t in kind for t in ("v4", "v5", "v6"))  # 128 MiB VMEM, 1 TC
    if known_big and not is_v7:
        return 100 * _MIB, False
    return 48 * _MIB, is_v7


def _sep_conv_kernel(w1_ref, w2_ref, b_ref, x_ref, o_ref):
    # w1_ref: (7,) SMEM   Conv2d(1,1,(1,7)) taps (W direction)
    # w2_ref: (7,) SMEM   Conv2d(1,1,(7,1)) taps (H direction)
    # b_ref : (1,) SMEM   fused bias = b1*sum(w2) + b2
    # x_ref : (b_blk*H_pad, W_pad) VMEM, lane/sublane dense (pad = don't-care)
    # o_ref : (b_blk, 1, Ho, Wo) VMEM -- exactly the valid output region
    rows, w_pad = x_ref.shape
    b_blk, _, ho, wo = o_ref.shape
    h_pad = rows // b_blk

    x = x_ref[...]

    # Conv2d(1,1,(1,7)) along W.  roll(x, w_pad-k, 1)[:, j] == x[:, (j+k) % w_pad];
    # the wrap / pad contamination only lands in columns j >= W-6, never stored.
    acc = x * w1_ref[0]
    for k in range(1, KW):
        acc = acc + pltpu.roll(x, shift=w_pad - k, axis=1) * w1_ref[k]

    # Conv2d(1,1,(7,1)) along H over the flattened row axis.  Cross-image /
    # pad-row contamination only lands in local rows i >= H-6, never stored.
    out = acc * w2_ref[0]
    for k in range(1, KH):
        out = out + pltpu.roll(acc, shift=rows - k, axis=0) * w2_ref[k]

    out = out + b_ref[0]                      # single fused bias add

    # Store only the valid window of every image (no crop pass in the wrapper).
    # Static, sublane-aligned slices of the live block value.
    for b in range(b_blk):
        o_ref[b, 0] = out[b * h_pad:b * h_pad + ho, :wo]


def model_3x1_and_1x3(x_nchw, w1, b1, w2, b2):
    """x_nchw: (N,1,H,W); w1: (1,1,1,7), b1: (1,); w2: (1,1,7,1), b2: (1,)."""
    N, C, H, W = x_nchw.shape
    assert C == 1 and H >= KH and W >= KW
    Ho, Wo = H - (KH - 1), W - (KW - 1)

    # Lane/sublane-dense working dims (no pad pass needed when already aligned).
    H_pad, W_pad = _round_up(H, 8), _round_up(W, 128)

    vmem_ceiling, want_two_blocks = _vmem_config()
    img_bytes = H_pad * W_pad * 4
    # ~8 block-sized f32 slabs live at once (in/out double buffers + x/acc/out
    # temporaries) -> budget one block at ~1/8 of the VMEM ceiling.
    block_budget = vmem_ceiling // 8

    # Largest divisor of N that fits the budget (no dummy images), capped at 64
    # to bound the static store unroll; on 2-TC chips prefer >= 2 grid steps.
    divisors = [d for d in range(1, min(N, 64) + 1) if N % d == 0]
    fitting = [d for d in divisors if d * img_bytes <= block_budget] or [1]
    if want_two_blocks and N >= 2:
        two = [d for d in fitting if N // d >= 2]
        fitting = two or fitting
    b_blk = max(fitting)
    num_blocks = N // b_blk
    rows_blk = b_blk * H_pad

    # TODO(synk): if a single image exceeds block_budget, row-tile with a
    #             6-row halo instead of whole-image slabs.
    vmem_limit = int(min(vmem_ceiling, max(32 * _MIB, 8 * b_blk * img_bytes)))

    x = x_nchw.reshape(N, H, W).astype(jnp.float32)
    if (H_pad, W_pad) != (H, W):
        # Only for unaligned shapes; pad values are don't-cares for valid outputs.
        x = jnp.pad(x, ((0, 0), (0, H_pad - H), (0, W_pad - W)))
    x_flat = x.reshape(N * H_pad, W_pad)       # free: merges leading dims

    w1_flat = w1.reshape(KW).astype(jnp.float32)
    w2_flat = w2.reshape(KH).astype(jnp.float32)
    # conv_h(conv_w(x) + b1) + b2 == conv_h(conv_w(x)) + b1*sum(w2) + b2
    fused_bias = (b1.reshape(-1)[0] * jnp.sum(w2_flat)
                  + b2.reshape(-1)[0]).astype(jnp.float32).reshape(1)

    out = pl.pallas_call(
        _sep_conv_kernel,
        out_shape=jax.ShapeDtypeStruct((N, 1, Ho, Wo), jnp.float32),
        grid_spec=pltpu.PrefetchScalarGridSpec(
            num_scalar_prefetch=0,
            grid=(num_blocks,),
            in_specs=[
                pl.BlockSpec(memory_space=pltpu.MemorySpace.SMEM),   # w1
                pl.BlockSpec(memory_space=pltpu.MemorySpace.SMEM),   # w2
                pl.BlockSpec(memory_space=pltpu.MemorySpace.SMEM),   # fused bias
                pl.BlockSpec((rows_blk, W_pad), lambda i: (i, 0)),
            ],
            out_specs=pl.BlockSpec((b_blk, 1, Ho, Wo), lambda i: (i, 0, 0, 0)),
        ),
        compiler_params=pltpu.CompilerParams(
            dimension_semantics=("parallel",),
            vmem_limit_bytes=vmem_limit,
        ),
    )(w1_flat, w2_flat, fused_bias, x_flat)
    return out                                                # (N,1,Ho,Wo)


def _reference(x_nchw, w1, b1, w2, b2):
    """Plain-JAX reference matching PyTorch Conv2d (cross-correlation)."""
    x = x_nchw[:, 0, :, :].astype(jnp.float32)
    N, H, W = x.shape
    Ho, Wo = H - (KH - 1), W - (KW - 1)
    w1f = w1.reshape(KW)
    w2f = w2.reshape(KH)
    tmp = sum(x[:, :, k:k + Wo] * w1f[k] for k in range(KW)) + b1[0]
    out = sum(tmp[:, k:k + Ho, :] * w2f[k] for k in range(KH)) + b2[0]
    return out[:, None, :, :]


if __name__ == "__main__":
    key = jax.random.PRNGKey(0)
    kx, kw1, kb1, kw2, kb2 = jax.random.split(key, 5)

    # Deterministic PyTorch-like parameter init (uniform bound 1/sqrt(fan_in)).
    bound1 = 1.0 / (1 * 1 * 7) ** 0.5
    w1 = jax.random.uniform(kw1, (1, 1, 1, 7), jnp.float32, -bound1, bound1)
    b1 = jax.random.uniform(kb1, (1,), jnp.float32, -bound1, bound1)
    bound2 = 1.0 / (1 * 7 * 1) ** 0.5
    w2 = jax.random.uniform(kw2, (1, 1, 7, 1), jnp.float32, -bound2, bound2)
    b2 = jax.random.uniform(kb2, (1,), jnp.float32, -bound2, bound2)

    # Small input consistent with the module (needs H, W >= 7).
    N, C, H, W = 2, 1, 16, 16
    x = jax.random.normal(kx, (N, C, H, W), dtype=jnp.float32)

    out = jax.block_until_ready(model_3x1_and_1x3(x, w1, b1, w2, b2))
    ref = jax.block_until_ready(_reference(x, w1, b1, w2, b2))
    assert out.shape == (N, 1, H - 6, W - 6), out.shape
    assert jnp.allclose(out, ref, atol=1e-4, rtol=1e-4), float(
        jnp.max(jnp.abs(out - ref)))

    # Guard the "valid region never reads padding" property on shapes that are
    # not multiples of (8, 128) and an odd batch.
    N2, H2, W2 = 3, 13, 20
    x2 = jax.random.normal(kx, (N2, 1, H2, W2), dtype=jnp.float32)
    out2 = jax.block_until_ready(model_3x1_and_1x3(x2, w1, b1, w2, b2))
    ref2 = jax.block_until_ready(_reference(x2, w1, b1, w2, b2))
    assert out2.shape == (N2, 1, H2 - 6, W2 - 6), out2.shape
    assert jnp.allclose(out2, ref2, atol=1e-4, rtol=1e-4), float(
        jnp.max(jnp.abs(out2 - ref2)))

    print("KERNEL_OK")
</pallas_src>

<mosaic_0001>
module attributes {stable_mosaic.version = 11 : i64} {
  func.func @_sep_conv_kernel(%arg0: i32, %arg1: memref<7xf32, #tpu.memory_space<smem>>, %arg2: memref<7xf32, #tpu.memory_space<smem>>, %arg3: memref<1xf32, #tpu.memory_space<smem>>, %arg4: memref<32x128xf32, #tpu.memory_space<vmem>>, %arg5: memref<2x1x10x10xf32, #tpu.memory_space<vmem>>) attributes {dimension_semantics = [#tpu.dimension_semantics<parallel>], iteration_bounds = array<i64: 1>, scalar_prefetch = 0 : i64, scratch_operands = 0 : i64, tpu.core_type = #tpu.core_type<tc>, window_params = [{transform_indices = @transform_0, window_bounds = array<i64: 7>}, {transform_indices = @transform_1, window_bounds = array<i64: 7>}, {transform_indices = @transform_2, window_bounds = array<i64: 1>}, {transform_indices = @transform_3, window_bounds = array<i64: 32, 128>}, {transform_indices = @transform_4, window_bounds = array<i64: 2, 1, 10, 10>}]} {
    %c0 = arith.constant 0 : index
    %c0_0 = arith.constant 0 : index
    %0 = vector.load %arg4[%c0, %c0_0] : memref<32x128xf32, #tpu.memory_space<vmem>>, vector<32x128xf32>
    %c0_1 = arith.constant 0 : index
    %1 = memref.load %arg1[%c0_1] : memref<7xf32, #tpu.memory_space<smem>>
    %2 = vector.broadcast %1 : f32 to vector<32x128xf32>
    %3 = arith.mulf %0, %2 : vector<32x128xf32>
    %c127_i32 = arith.constant 127 : i32
    %4 = tpu.dynamic_rotate %0 by %c127_i32 dim 1 : vector<32x128xf32>, i32 -> vector<32x128xf32>
    %c1 = arith.constant 1 : index
    %5 = memref.load %arg1[%c1] : memref<7xf32, #tpu.memory_space<smem>>
    %6 = vector.broadcast %5 : f32 to vector<32x128xf32>
    %7 = arith.mulf %4, %6 : vector<32x128xf32>
    %8 = arith.addf %3, %7 : vector<32x128xf32>
    %c126_i32 = arith.constant 126 : i32
    %9 = tpu.dynamic_rotate %0 by %c126_i32 dim 1 : vector<32x128xf32>, i32 -> vector<32x128xf32>
    %c2 = arith.constant 2 : index
    %10 = memref.load %arg1[%c2] : memref<7xf32, #tpu.memory_space<smem>>
    %11 = vector.broadcast %10 : f32 to vector<32x128xf32>
    %12 = arith.mulf %9, %11 : vector<32x128xf32>
    %13 = arith.addf %8, %12 : vector<32x128xf32>
    %c125_i32 = arith.constant 125 : i32
    %14 = tpu.dynamic_rotate %0 by %c125_i32 dim 1 : vector<32x128xf32>, i32 -> vector<32x128xf32>
    %c3 = arith.constant 3 : index
    %15 = memref.load %arg1[%c3] : memref<7xf32, #tpu.memory_space<smem>>
    %16 = vector.broadcast %15 : f32 to vector<32x128xf32>
    %17 = arith.mulf %14, %16 : vector<32x128xf32>
    %18 = arith.addf %13, %17 : vector<32x128xf32>
    %c124_i32 = arith.constant 124 : i32
    %19 = tpu.dynamic_rotate %0 by %c124_i32 dim 1 : vector<32x128xf32>, i32 -> vector<32x128xf32>
    %c4 = arith.constant 4 : index
    %20 = memref.load %arg1[%c4] : memref<7xf32, #tpu.memory_space<smem>>
    %21 = vector.broadcast %20 : f32 to vector<32x128xf32>
    %22 = arith.mulf %19, %21 : vector<32x128xf32>
    %23 = arith.addf %18, %22 : vector<32x128xf32>
    %c123_i32 = arith.constant 123 : i32
    %24 = tpu.dynamic_rotate %0 by %c123_i32 dim 1 : vector<32x128xf32>, i32 -> vector<32x128xf32>
    %c5 = arith.constant 5 : index
    %25 = memref.load %arg1[%c5] : memref<7xf32, #tpu.memory_space<smem>>
    %26 = vector.broadcast %25 : f32 to vector<32x128xf32>
    %27 = arith.mulf %24, %26 : vector<32x128xf32>
    %28 = arith.addf %23, %27 : vector<32x128xf32>
    %c122_i32 = arith.constant 122 : i32
    %29 = tpu.dynamic_rotate %0 by %c122_i32 dim 1 : vector<32x128xf32>, i32 -> vector<32x128xf32>
    %c6 = arith.constant 6 : index
    %30 = memref.load %arg1[%c6] : memref<7xf32, #tpu.memory_space<smem>>
    %31 = vector.broadcast %30 : f32 to vector<32x128xf32>
    %32 = arith.mulf %29, %31 : vector<32x128xf32>
    %33 = arith.addf %28, %32 : vector<32x128xf32>
    %c0_2 = arith.constant 0 : index
    %34 = memref.load %arg2[%c0_2] : memref<7xf32, #tpu.memory_space<smem>>
    %35 = vector.broadcast %34 : f32 to vector<32x128xf32>
    %36 = arith.mulf %33, %35 : vector<32x128xf32>
    %c31_i32 = arith.constant 31 : i32
    %37 = tpu.dynamic_rotate %33 by %c31_i32 dim 0 : vector<32x128xf32>, i32 -> vector<32x128xf32>
    %c1_3 = arith.constant 1 : index
    %38 = memref.load %arg2[%c1_3] : memref<7xf32, #tpu.memory_space<smem>>
    %39 = vector.broadcast %38 : f32 to vector<32x128xf32>
    %40 = arith.mulf %37, %39 : vector<32x128xf32>
    %41 = arith.addf %36, %40 : vector<32x128xf32>
    %c30_i32 = arith.constant 30 : i32
    %42 = tpu.dynamic_rotate %33 by %c30_i32 dim 0 : vector<32x128xf32>, i32 -> vector<32x128xf32>
    %c2_4 = arith.constant 2 : index
    %43 = memref.load %arg2[%c2_4] : memref<7xf32, #tpu.memory_space<smem>>
    %44 = vector.broadcast %43 : f32 to vector<32x128xf32>
    %45 = arith.mulf %42, %44 : vector<32x128xf32>
    %46 = arith.addf %41, %45 : vector<32x128xf32>
    %c29_i32 = arith.constant 29 : i32
    %47 = tpu.dynamic_rotate %33 by %c29_i32 dim 0 : vector<32x128xf32>, i32 -> vector<32x128xf32>
    %c3_5 = arith.constant 3 : index
    %48 = memref.load %arg2[%c3_5] : memref<7xf32, #tpu.memory_space<smem>>
    %49 = vector.broadcast %48 : f32 to vector<32x128xf32>
    %50 = arith.mulf %47, %49 : vector<32x128xf32>
    %51 = arith.addf %46, %50 : vector<32x128xf32>
    %c28_i32 = arith.constant 28 : i32
    %52 = tpu.dynamic_rotate %33 by %c28_i32 dim 0 : vector<32x128xf32>, i32 -> vector<32x128xf32>
    %c4_6 = arith.constant 4 : index
    %53 = memref.load %arg2[%c4_6] : memref<7xf32, #tpu.memory_space<smem>>
    %54 = vector.broadcast %53 : f32 to vector<32x128xf32>
    %55 = arith.mulf %52, %54 : vector<32x128xf32>
    %56 = arith.addf %51, %55 : vector<32x128xf32>
    %c27_i32 = arith.constant 27 : i32
    %57 = tpu.dynamic_rotate %33 by %c27_i32 dim 0 : vector<32x128xf32>, i32 -> vector<32x128xf32>
    %c5_7 = arith.constant 5 : index
    %58 = memref.load %arg2[%c5_7] : memref<7xf32, #tpu.memory_space<smem>>
    %59 = vector.broadcast %58 : f32 to vector<32x128xf32>
    %60 = arith.mulf %57, %59 : vector<32x128xf32>
    %61 = arith.addf %56, %60 : vector<32x128xf32>
    %c26_i32 = arith.constant 26 : i32
    %62 = tpu.dynamic_rotate %33 by %c26_i32 dim 0 : vector<32x128xf32>, i32 -> vector<32x128xf32>
    %c6_8 = arith.constant 6 : index
    %63 = memref.load %arg2[%c6_8] : memref<7xf32, #tpu.memory_space<smem>>
    %64 = vector.broadcast %63 : f32 to vector<32x128xf32>
    %65 = arith.mulf %62, %64 : vector<32x128xf32>
    %66 = arith.addf %61, %65 : vector<32x128xf32>
    %c0_9 = arith.constant 0 : index
    %67 = memref.load %arg3[%c0_9] : memref<1xf32, #tpu.memory_space<smem>>
    %68 = vector.broadcast %67 : f32 to vector<32x128xf32>
    %69 = arith.addf %66, %68 : vector<32x128xf32>
    %70 = vector.extract_strided_slice %69 {offsets = [0, 0], sizes = [10, 10], strides = [1, 1]} : vector<32x128xf32> to vector<10x10xf32>
    %c0_10 = arith.constant 0 : index
    %c0_11 = arith.constant 0 : index
    %c0_12 = arith.constant 0 : index
    %c0_13 = arith.constant 0 : index
    %71 = vector.load %arg5[%c0_10, %c0_11, %c0_12, %c0_13] : memref<2x1x10x10xf32, #tpu.memory_space<vmem>>, vector<1x1x10x10xf32>
    %72 = vector.shape_cast %71 : vector<1x1x10x10xf32> to vector<10x10xf32>
    %73 = vector.shape_cast %70 : vector<10x10xf32> to vector<1x1x10x10xf32>
    tpu.vector_store %arg5[%c0_10, %c0_11, %c0_12, %c0_13], %73 {strides = array<i32>} : memref<2x1x10x10xf32, #tpu.memory_space<vmem>>, vector<1x1x10x10xf32>,
    %74 = vector.extract_strided_slice %69 {offsets = [16, 0], sizes = [10, 10], strides = [1, 1]} : vector<32x128xf32> to vector<10x10xf32>
    %c1_14 = arith.constant 1 : index
    %c0_15 = arith.constant 0 : index
    %c0_16 = arith.constant 0 : index
    %c0_17 = arith.constant 0 : index
    %75 = vector.load %arg5[%c1_14, %c0_15, %c0_16, %c0_17] : memref<2x1x10x10xf32, #tpu.memory_space<vmem>>, vector<1x1x10x10xf32>
    %76 = vector.shape_cast %75 : vector<1x1x10x10xf32> to vector<10x10xf32>
    %77 = vector.shape_cast %74 : vector<10x10xf32> to vector<1x1x10x10xf32>
    tpu.vector_store %arg5[%c1_14, %c0_15, %c0_16, %c0_17], %77 {strides = array<i32>} : memref<2x1x10x10xf32, #tpu.memory_space<vmem>>, vector<1x1x10x10xf32>,
    return
  }
  func.func @transform_0(%arg0: i32) -> i32 {
    %c0_i32 = arith.constant 0 : i32
    %c0_i32_0 = arith.constant 0 : i32
    return %c0_i32 : i32
  }
  func.func @transform_1(%arg0: i32) -> i32 {
    %c0_i32 = arith.constant 0 : i32
    %c0_i32_0 = arith.constant 0 : i32
    return %c0_i32 : i32
  }
  func.func @transform_2(%arg0: i32) -> i32 {
    %c0_i32 = arith.constant 0 : i32
    %c0_i32_0 = arith.constant 0 : i32
    return %c0_i32 : i32
  }
  func.func @transform_3(%arg0: i32) -> (i32, i32) {
    %c0_i32 = arith.constant 0 : i32
    %c0_i32_0 = arith.constant 0 : i32
    return %arg0, %c0_i32 : i32, i32
  }
  func.func @transform_4(%arg0: i32) -> (i32, i32, i32, i32) {
    %c0_i32 = arith.constant 0 : i32
    %c0_i32_0 = arith.constant 0 : i32
    %c0_i32_1 = arith.constant 0 : i32
    %c0_i32_2 = arith.constant 0 : i32
    return %arg0, %c0_i32, %c0_i32_0, %c0_i32_1 : i32, i32, i32, i32
  }
}

</mosaic_0001>

<bundles_post_ra>
// kernel: tpu_custom_call.1
= control target key start
LH: loop header
LB: loop body
LE: loop exit
PB: predicated region body
PF: predicated region fallthrough
CT: control target
= control target key end

     0   :  { %10 = vsyncpa [#allocation5], 0  ;;  %s670_s0 = inlined_call_operand.vmem [shape: f32[7], index: 0, kind: input, shape index: {}]   ;;  %s671_s1 = inlined_call_operand.vmem [shape: f32[7], index: 1, kind: input, shape index: {}]   ;;  %s672_s2 = inlined_call_operand.<no memory space> [shape: f32[1], index: 2, kind: input, shape index: {}]   ;;  %s673_s3 = inlined_call_operand.hbm [shape: f32[32,128], index: 3, kind: input, shape index: {}]   ;;  %s674_s4 = inlined_call_operand.vmem [shape: f32[2,1,10,10], index: 4, kind: output, shape index: {}]  }
   0x1   :  { %11 = vsyncpa [#allocation7], 0  ;;  %s19_s17 = sshll.u32 %s670_s0, 4  ;;  %s20_s17 = int_to_ptr.vmem [resolvable:$true] %s19_s17 }
   0x2   :  { %12 = vsyncpa [#allocation4], 0  ;;  %s29_s20 = sshll.u32 %s671_s1, 4  ;;  %s342_s21 = scalar_lea.vmem %s20_s17, 16  ;;  %s30_s20 = int_to_ptr.vmem [resolvable:$true] %s29_s20 }
   0x3   :  { %p343_p0 = scmp.ne.s32.totalorder %s20_s17, %s342_s21  ;;  %p347_p1 = scmp.lt.s32.totalorder %s20_s17, %s20_s17 }
   0x4   :  { %p348_p2 = scmp.lt.s32.totalorder %s342_s21, %s342_s21 }
   0x6   :  { %p349_p3 = por %p348_p2, %p347_p1 }
   0x8   :  { %p350_p4 = pnand %p349_p3, %p343_p0 }
   0xa   :  { %353 = shalt.err (!%p350_p4)
}
   0xb   :  { %s394_s22 = smov [#allocation3]   ;;  %s354_s23 = scalar_lea.vmem %s30_s20, 16 }
   0xc   :  { %22 = dma.vmem_to_smem %s20_s17, 16, %s394_s22, [#allocation5]  }
   0xd   :  { %p355_p5 = scmp.ne.s32.totalorder %s30_s20, %s354_s23  ;;  %p359_p6 = scmp.lt.s32.totalorder %s30_s20, %s30_s20 }
   0xe   :  { %p360_p7 = scmp.lt.s32.totalorder %s354_s23, %s354_s23 }
  0x10   :  { %p361_p8 = por %p360_p7, %p359_p6 }
  0x12   :  { %p362_p9 = pnand %p361_p8, %p355_p5 }
  0x14   :  { %365 = shalt.err (!%p362_p9)
}
  0x15   :  { %s395_s0 = smov [#allocation6]   ;;  %s396_s1 = smov [#allocation8]  }
  0x16   :  { %32 = dma.vmem_to_smem %s30_s20, 16, %s395_s0, [#allocation7]  }
  0x17   :  { %s40_s24 = sshll.u32 %s396_s1, 4  ;;  %s366_s27 = scalar_lea.hbm %s673_s3, 512  ;;  %s41_s24 = int_to_ptr.vmem [resolvable:$true] %s40_s24 }
  0x18   :  { %p367_p10 = scmp.ne.s32.totalorder %s673_s3, %s366_s27  ;;  %p370_p11 = scmp.lt.u32.totalorder %s366_s27, %s673_s3 }
  0x1a   :  { %p372_p12 = pnand %p370_p11, %p367_p10 }
  0x1c   :  { %375 = shalt.err (!%p372_p12)
}
  0x1d   :  { %s376_s6 = scalar_lea.vmem %s41_s24, 512  ;;  %p381_p0 = scmp.lt.s32.totalorder %s41_s24, %s41_s24 }
  0x1e   :  { %p377_p13 = scmp.ne.s32.totalorder %s41_s24, %s376_s6  ;;  %p382_p1 = scmp.lt.s32.totalorder %s376_s6, %s376_s6 }
  0x20   :  { %p383_p2 = por %p382_p1, %p381_p0 }
  0x22   :  { %p384_p3 = pnand %p383_p2, %p377_p13 }
  0x24   :  { %387 = shalt.err (!%p384_p3)
}
  0x25   :  { %s397_s7 = smov 128   ;;  %s398_s8 = smov 8  }
  0x26   :  { %46 = dma.hbm_to_vmem [thread:$0]  %s673_s3, 512, %s41_s24, [#allocation4], %s397_s7, %s397_s7, %s398_s8  }
  0x27   :  { %388 = dma.done.wait [#allocation5], 16  }
  0x28   :  { %389 = vsyncadd [#allocation5], 4294967280 }
  0x29   :  { %390 = dma.done.wait [#allocation7], 16  }
  0x2a   :  { %391 = vsyncadd [#allocation7], 4294967280 }
  0x2b   :  { %392 = dma.done.wait [#allocation4], 512  }
  0x2c   :  { %393 = vsyncadd [#allocation4], 4294966784 }
  0x2d   :  { %56 = sfence }
  0x2e   :  { %v448_v0 = vld [vmem:[#allocation8 + $0x10] sm:$0xff]  ;;  %v57_v1 = vld [vmem:[#allocation8] sm:$0xff]  ;;  %s399_s11 = smov 127   ;;  %v451_v2 = vld [vmem:[#allocation8 + $0x18] sm:$0xff]  ;;  %s400_s3 = smov 126   ;;  %v185_v28 = vlaneseq  ;;  %v493_v60 = vstv %s672_s2  ;;  %vm303_vm6 = vcmask 80896  }
  0x2f   :  { %71 = vrot.lane.b32.xlu1 %v448_v0, %s399_s11  ;;  %67 = vrot.lane.b32.xlu0 %v57_v1, %s399_s11  ;;  %v58_v3 = vld [vmem:[#allocation8 + $0x8] sm:$0xff]  ;;  %s401_s12 = smov 125   ;;  %s402_s13 = smov 124   ;;  %vm305_vm7 = vcmask 74752  }
  0x30   :  { %s403_s14 = smov 123   ;;  %s404_s15 = smov 122   ;;  %v474_v42 = vshrl.u32 %v185_v28, 7 }
  0x31   :  { %s61_s16 = sld [smem:[#allocation3]]  ;;  %s317_s17 = sld [smem:[#allocation3 + $0x1]] }
  0x32   :  { %s318_s18 = sld [smem:[#allocation3 + $0x2]]  ;;  %s319_s19 = sld [smem:[#allocation3 + $0x3]]  ;;  %vm187_vm0 = vcmp.lt.s32.totalorder %v474_v42, 7  ;;  %vm206_vm1 = vcmp.lt.s32.totalorder %v474_v42, 6  ;;  %vm225_vm2 = vcmp.lt.s32.totalorder %v474_v42, 5  ;;  %vm244_vm3 = vcmp.lt.s32.totalorder %v474_v42, 4 }
  0x33   :  { %73 = vrot.lane.b32.xlu1 %v451_v2, %s399_s11  ;;  %69 = vrot.lane.b32.xlu0 %v58_v3, %s399_s11  ;;  %s320_s20 = sld [smem:[#allocation3 + $0x4]]  ;;  %s321_s21 = sld [smem:[#allocation3 + $0x5]]  ;;  %vm263_vm4 = vcmp.lt.s32.totalorder %v474_v42, 3  ;;  %vm282_vm5 = vcmp.lt.s32.totalorder %v474_v42, 2 }
  0x34   :  { %s464_s22 = sld [smem:[#allocation3 + $0x6]]  ;;  %s466_s23 = sld [smem:[#allocation6]] }
  0x35   :  { %s469_s0 = sld [smem:[#allocation6 + $0x1]]  ;;  %s471_s1 = sld [smem:[#allocation6 + $0x2]] }
  0x36   :  { %s479_s24 = sld [smem:[#allocation6 + $0x3]]  ;;  %s481_s25 = sld [smem:[#allocation6 + $0x4]] }
  0x37   :  { %87 = vrot.lane.b32.xlu1 %v58_v3, %s400_s3  ;;  %85 = vrot.lane.b32.xlu0 %v57_v1, %s400_s3  ;;  %v62_v18 = vstv %s61_s16  ;;  %v76_v19 = vstv %s317_s17  ;;  %s483_s26 = sld [smem:[#allocation6 + $0x5]]  ;;  %s485_s27 = sld [smem:[#allocation6 + $0x6]] }
  0x38   :  { %v94_v20 = vstv %s318_s18  ;;  %v64_v21 = vmul.f32 %v62_v18, %v58_v3  ;;  %v63_v25 = vmul.f32 %v62_v18, %v57_v1  ;;  %v112_v27 = vstv %s319_s19 }
  0x39   :  { %v66_v30 = vmul.f32 %v62_v18, %v451_v2  ;;  %v130_v33 = vstv %s320_s20  ;;  %v65_v34 = vmul.f32 %v62_v18, %v448_v0  ;;  %v148_v41 = vstv %s321_s21 }
  0x3a   :  { %v477_v50 = vstv %s464_s22  ;;  %v488_v59 = vstv %s466_s23 }
  0x3b   :  { %91 = vrot.lane.b32.xlu1 %v451_v2, %s400_s3  ;;  %89 = vrot.lane.b32.xlu0 %v448_v0, %s400_s3 }
  0x3f   :  { %105 = vrot.lane.b32.xlu1 %v58_v3, %s401_s12  ;;  %103 = vrot.lane.b32.xlu0 %v57_v1, %s401_s12 }
  0x43   :  { %109 = vrot.lane.b32.xlu1 %v451_v2, %s401_s12  ;;  %107 = vrot.lane.b32.xlu0 %v448_v0, %s401_s12 }
  0x47   :  { %123 = vrot.lane.b32.xlu1 %v58_v3, %s402_s13  ;;  %121 = vrot.lane.b32.xlu0 %v57_v1, %s402_s13 }
  0x4b   :  { %127 = vrot.lane.b32.xlu1 %v451_v2, %s402_s13  ;;  %125 = vrot.lane.b32.xlu0 %v448_v0, %s402_s13 }
  0x4f   :  { %141 = vrot.lane.b32.xlu1 %v58_v3, %s403_s14  ;;  %139 = vrot.lane.b32.xlu0 %v57_v1, %s403_s14 }
  0x53   :  { %145 = vrot.lane.b32.xlu1 %v451_v2, %s403_s14  ;;  %143 = vrot.lane.b32.xlu0 %v448_v0, %s403_s14 }
  0x57   :  { %159 = vrot.lane.b32.xlu1 %v58_v3, %s404_s15  ;;  %157 = vrot.lane.b32.xlu0 %v57_v1, %s404_s15  ;;  %v500_v3 = vstv %s469_s0 }
  0x5b   :  { %163 = vrot.lane.b32.xlu1 %v451_v2, %s404_s15  ;;  %161 = vrot.lane.b32.xlu0 %v448_v0, %s404_s15 }
  0xa1   :  { %v72_v4 = vpop.permute.xlu1 %71  ;;  %v68_v5 = vpop.permute.xlu0 %67 }
  0xa2   :  { %v77_v26 = vmul.f32 %v76_v19, %v68_v5  ;;  %v79_v43 = vmul.f32 %v76_v19, %v72_v4  ;;  %v503_v4 = vstv %s471_s1 }
  0xa4   :  { %v81_v39 = vadd.f32 %v77_v26, %v63_v25  ;;  %v83_v61 = vadd.f32 %v79_v43, %v65_v34 }
  0xa5   :  { %v74_v6 = vpop.permute.xlu1 %73  ;;  %v70_v7 = vpop.permute.xlu0 %69 }
  0xa6   :  { %v78_v22 = vmul.f32 %v76_v19, %v70_v7  ;;  %v80_v31 = vmul.f32 %v76_v19, %v74_v6  ;;  %v512_v19 = vstv %s479_s24 }
  0xa8   :  { %v82_v35 = vadd.f32 %v78_v22, %v64_v21  ;;  %v84_v47 = vadd.f32 %v80_v31, %v66_v30  ;;  %v515_v22 = vstv %s481_s25 }
  0xa9   :  { %v88_v8 = vpop.permute.xlu1 %87  ;;  %v86_v9 = vpop.permute.xlu0 %85 }
  0xaa   :  { %v96_v29 = vmul.f32 %v94_v20, %v88_v8  ;;  %v95_v32 = vmul.f32 %v94_v20, %v86_v9 }
  0xac   :  { %v100_v44 = vadd.f32 %v96_v29, %v82_v35  ;;  %v99_v48 = vadd.f32 %v95_v32, %v81_v39 }
  0xad   :  { %v92_v10 = vpop.permute.xlu1 %91  ;;  %v90_v11 = vpop.permute.xlu0 %89 }
  0xae   :  { %v98_v45 = vmul.f32 %v94_v20, %v92_v10  ;;  %v97_v51 = vmul.f32 %v94_v20, %v90_v11 }
  0xb0   :  { %v102_v62 = vadd.f32 %v98_v45, %v84_v47  ;;  %v101_v5 = vadd.f32 %v97_v51, %v83_v61 }
  0xb1   :  { %v106_v12 = vpop.permute.xlu1 %105  ;;  %v104_v13 = vpop.permute.xlu0 %103 }
  0xb2   :  { %v114_v36 = vmul.f32 %v112_v27, %v106_v12  ;;  %v113_v40 = vmul.f32 %v112_v27, %v104_v13 }
  0xb4   :  { %v118_v52 = vadd.f32 %v114_v36, %v100_v44  ;;  %v117_v57 = vadd.f32 %v113_v40, %v99_v48 }
  0xb5   :  { %v110_v14 = vpop.permute.xlu1 %109  ;;  %v108_v15 = vpop.permute.xlu0 %107 }
  0xb6   :  { %v116_v53 = vmul.f32 %v112_v27, %v110_v14  ;;  %v115_v63 = vmul.f32 %v112_v27, %v108_v15 }
  0xb8   :  { %v120_v6 = vadd.f32 %v116_v53, %v102_v62  ;;  %v119_v15 = vadd.f32 %v115_v63, %v101_v5 }
  0xb9   :  { %v124_v16 = vpop.permute.xlu1 %123  ;;  %v122_v17 = vpop.permute.xlu0 %121 }
  0xba   :  { %v132_v46 = vmul.f32 %v130_v33, %v124_v16  ;;  %v131_v49 = vmul.f32 %v130_v33, %v122_v17 }
  0xbc   :  { %v136_v0 = vadd.f32 %v132_v46, %v118_v52  ;;  %v135_v1 = vadd.f32 %v131_v49, %v117_v57 }
  0xbd   :  { %v128_v23 = vpop.permute.xlu1 %127  ;;  %v126_v24 = vpop.permute.xlu0 %125 }
  0xbe   :  { %v134_v2 = vmul.f32 %v130_v33, %v128_v23  ;;  %v133_v7 = vmul.f32 %v130_v33, %v126_v24  ;;  %v518_v23 = vstv %s483_s26  ;;  %v521_v24 = vstv %s485_s27 }
  0xc0   :  { %v138_v17 = vadd.f32 %v134_v2, %v120_v6  ;;  %v137_v21 = vadd.f32 %v133_v7, %v119_v15 }
  0xc1   :  { %v142_v37 = vpop.permute.xlu1 %141  ;;  %v140_v38 = vpop.permute.xlu0 %139 }
  0xc2   :  { %v150_v54 = vmul.f32 %v148_v41, %v142_v37  ;;  %v149_v58 = vmul.f32 %v148_v41, %v140_v38 }
  0xc4   :  { %v154_v8 = vadd.f32 %v150_v54, %v136_v0  ;;  %v153_v11 = vadd.f32 %v149_v58, %v135_v1 }
  0xc5   :  { %v146_v55 = vpop.permute.xlu1 %145  ;;  %v144_v56 = vpop.permute.xlu0 %143 }
  0xc6   :  { %v152_v12 = vmul.f32 %v148_v41, %v146_v55  ;;  %v151_v16 = vmul.f32 %v148_v41, %v144_v56 }
  0xc8   :  { %v156_v25 = vadd.f32 %v152_v12, %v138_v17  ;;  %v155_v31 = vadd.f32 %v151_v16, %v137_v21 }
  0xc9   :  { %v160_v9 = vpop.permute.xlu1 %159  ;;  %v158_v10 = vpop.permute.xlu0 %157 }
  0xca   :  { %v168_v13 = vmul.f32 %v477_v50, %v160_v9  ;;  %v167_v14 = vmul.f32 %v477_v50, %v158_v10 }
  0xcc   :  { %v509_v18 = vadd.f32 %v168_v13, %v154_v8  ;;  %v171_v20 = vadd.f32 %v167_v14, %v153_v11 }
  0xcd   :  { %v164_v29 = vpop.permute.xlu1 %163  ;;  %v162_v30 = vpop.permute.xlu0 %161 }
  0xce   :  { %v182_v26 = vrot.slane %v509_v18, 1  ;;  %v203_v27 = vrot.slane %v509_v18, 2  ;;  %v222_v28 = vrot.slane %v509_v18, 3  ;;  %v241_v32 = vrot.slane %v509_v18, 4 }
  0xcf   :  { %v260_v33 = vrot.slane %v509_v18, 5  ;;  %v279_v34 = vrot.slane %v509_v18, 6  ;;  %v181_v35 = vrot.slane %v171_v20, 1  ;;  %v202_v36 = vrot.slane %v171_v20, 2 }
  0xd0   :  { %v221_v37 = vrot.slane %v171_v20, 3  ;;  %v240_v38 = vrot.slane %v171_v20, 4  ;;  %v259_v39 = vrot.slane %v171_v20, 5  ;;  %v278_v40 = vrot.slane %v171_v20, 6 }
  0xd1   :  { %v170_v41 = vmul.f32 %v477_v50, %v164_v29  ;;  %v169_v43 = vmul.f32 %v477_v50, %v162_v30  ;;  %v190_v44 = vsel %vm187_vm0, %v181_v35, %v182_v26  ;;  %v209_v45 = vsel %vm206_vm1, %v202_v36, %v203_v27 }
  0xd2   :  { %v228_v46 = vsel %vm225_vm2, %v221_v37, %v222_v28  ;;  %v247_v47 = vsel %vm244_vm3, %v240_v38, %v241_v32  ;;  %v178_v48 = vmul.f32 %v488_v59, %v509_v18  ;;  %v177_v49 = vmul.f32 %v488_v59, %v171_v20 }
  0xd3   :  { %v194_v50 = vmul.f32 %v500_v3, %v190_v44  ;;  %v213_v51 = vmul.f32 %v503_v4, %v209_v45  ;;  %v232_v52 = vmul.f32 %v512_v19, %v228_v46  ;;  %v266_v53 = vsel %vm263_vm4, %v259_v39, %v260_v33 }
  0xd4   :  { %v285_v54 = vsel %vm282_vm5, %v278_v40, %v279_v34  ;;  %v559_v55 = vadd.f32 %v170_v41, %v156_v25  ;;  %v251_v57 = vmul.f32 %v515_v22, %v247_v47  ;;  %v270_v58 = vmul.f32 %v518_v23, %v266_v53 }
  0xd5   :  { %v198_v56 = vadd.f32 %v194_v50, %v177_v49  ;;  %v563_v61 = vadd.f32 %v169_v43, %v155_v31  ;;  %v289_v62 = vmul.f32 %v521_v24, %v285_v54 }
  0xd6   :  { %v184_v63 = vrot.slane %v559_v55, 1  ;;  %v205_v0 = vrot.slane %v559_v55, 2  ;;  %v224_v1 = vrot.slane %v559_v55, 3  ;;  %v243_v5 = vrot.slane %v559_v55, 4 }
  0xd7   :  { %v217_v2 = vadd.f32 %v213_v51, %v198_v56  ;;  %v262_v6 = vrot.slane %v559_v55, 5  ;;  %v281_v7 = vrot.slane %v559_v55, 6  ;;  %v180_v8 = vmul.f32 %v488_v59, %v559_v55 }
  0xd8   :  { %v191_v9 = vsel %vm187_vm0, %v184_v63, %v181_v35  ;;  %v210_v10 = vsel %vm206_vm1, %v205_v0, %v202_v36  ;;  %v229_v11 = vsel %vm225_vm2, %v224_v1, %v221_v37  ;;  %v179_v15 = vmul.f32 %v488_v59, %v563_v61 }
  0xd9   :  { %v236_v12 = vadd.f32 %v232_v52, %v217_v2  ;;  %v197_v13 = vmul.f32 %v500_v3, %v191_v9  ;;  %v216_v14 = vmul.f32 %v503_v4, %v210_v10  ;;  %v248_v16 = vsel %vm244_vm3, %v243_v5, %v240_v38 }
  0xda   :  { %v267_v17 = vsel %vm263_vm4, %v262_v6, %v259_v39  ;;  %v286_v20 = vsel %vm282_vm5, %v281_v7, %v278_v40  ;;  %v183_v21 = vrot.slane %v563_v61, 1  ;;  %v235_v30 = vmul.f32 %v512_v19, %v229_v11 }
  0xdb   :  { %v255_v25 = vadd.f32 %v251_v57, %v236_v12  ;;  %v201_v29 = vadd.f32 %v197_v13, %v180_v8  ;;  %v254_v31 = vmul.f32 %v515_v22, %v248_v16  ;;  %v273_v59 = vmul.f32 %v518_v23, %v267_v17 }
  0xdc   :  { %v188_v35 = vsel %vm187_vm0, %v183_v21, %v184_v63  ;;  %v189_v36 = vsel %vm187_vm0, %v182_v26, %v183_v21  ;;  %v204_v37 = vrot.slane %v563_v61, 2  ;;  %v223_v45 = vrot.slane %v563_v61, 3 }
  0xdd   :  { %v274_v38 = vadd.f32 %v270_v58, %v255_v25  ;;  %v220_v39 = vadd.f32 %v216_v14, %v201_v29  ;;  %v195_v40 = vmul.f32 %v500_v3, %v189_v36  ;;  %v196_v41 = vmul.f32 %v500_v3, %v188_v35 }
  0xde   :  { %v207_v43 = vsel %vm206_vm1, %v204_v37, %v205_v0  ;;  %v208_v44 = vsel %vm206_vm1, %v203_v27, %v204_v37  ;;  %v242_v26 = vrot.slane %v563_v61, 4  ;;  %v226_v52 = vsel %vm225_vm2, %v223_v45, %v224_v1 }
  0xdf   :  { %v293_v46 = vadd.f32 %v289_v62, %v274_v38  ;;  %v239_v47 = vadd.f32 %v235_v30, %v220_v39  ;;  %v199_v49 = vadd.f32 %v195_v40, %v178_v48  ;;  %v200_v50 = vadd.f32 %v196_v41, %v179_v15 }
  0xe0   :  { %v214_v51 = vmul.f32 %v503_v4, %v208_v44  ;;  %v215_v3 = vmul.f32 %v503_v4, %v207_v43  ;;  %v227_v27 = vsel %vm225_vm2, %v222_v28, %v223_v45  ;;  %v234_v48 = vmul.f32 %v512_v19, %v226_v52 }
  0xe1   :  { %v299_v53 = vadd.f32 %v493_v60, %v293_v46  ;;  %v258_v54 = vadd.f32 %v254_v31, %v239_v47  ;;  %v233_v56 = vmul.f32 %v512_v19, %v227_v27  ;;  %v245_v4 = vsel %vm244_vm3, %v242_v26, %v243_v5 }
  0xe2   :  { %v218_v57 = vadd.f32 %v214_v51, %v199_v49  ;;  %v219_v58 = vadd.f32 %v215_v3, %v200_v50  ;;  %v246_v62 = vsel %vm244_vm3, %v241_v32, %v242_v26  ;;  %v292_v63 = vmul.f32 %v521_v24, %v286_v20 }
  0xe3   :  { %304 = vst.msk [vmem:[%s674_s4] sm:$0xff] %vm303_vm6, %v299_v53  ;;  %v277_v28 = vadd.f32 %v273_v59, %v258_v54  ;;  %v252_v19 = vmul.f32 %v515_v22, %v246_v62  ;;  %v261_v0 = vrot.slane %v563_v61, 5  ;;  %v253_v5 = vmul.f32 %v515_v22, %v245_v4 }
  0xe4   :  { %v237_v1 = vadd.f32 %v233_v56, %v218_v57  ;;  %v238_v2 = vadd.f32 %v234_v48, %v219_v58  ;;  %v280_v8 = vrot.slane %v563_v61, 6 }
  0xe5   :  { %v296_v32 = vadd.f32 %v292_v63, %v277_v28  ;;  %v264_v9 = vsel %vm263_vm4, %v261_v0, %v262_v6  ;;  %v265_v10 = vsel %vm263_vm4, %v260_v33, %v261_v0 }
  0xe6   :  { %v256_v11 = vadd.f32 %v252_v19, %v237_v1  ;;  %v257_v12 = vadd.f32 %v253_v5, %v238_v2  ;;  %v271_v13 = vmul.f32 %v518_v23, %v265_v10  ;;  %v272_v14 = vmul.f32 %v518_v23, %v264_v9 }
  0xe7   :  { %v302_v22 = vadd.f32 %v493_v60, %v296_v32  ;;  %v283_v61 = vsel %vm282_vm5, %v280_v8, %v281_v7  ;;  %v284_v6 = vsel %vm282_vm5, %v279_v34, %v280_v8 }
  0xe8   :  { %v275_v15 = vadd.f32 %v271_v13, %v256_v11  ;;  %v276_v33 = vadd.f32 %v272_v14, %v257_v12  ;;  %v290_v16 = vmul.f32 %v521_v24, %v284_v6  ;;  %v291_v17 = vmul.f32 %v521_v24, %v283_v61 }
  0xe9   :  { %330 = vst.msk [vmem:[%s674_s4 + $0x18] sm:$0x3] %vm305_vm7, %v302_v22 }
  0xea   :  { %v294_v23 = vadd.f32 %v290_v16, %v275_v15  ;;  %v295_v55 = vadd.f32 %v291_v17, %v276_v33 }
  0xec   :  { %v300_v7 = vadd.f32 %v493_v60, %v294_v23  ;;  %v301_v18 = vadd.f32 %v493_v60, %v295_v55 }
  0xee   :  { %306 = vst.msk [vmem:[%s674_s4 + $0x8] sm:$0x3] %vm305_vm7, %v300_v7 }
  0xef   :  { %329 = vst.msk [vmem:[%s674_s4 + $0x10] sm:$0xff] %vm303_vm6, %v301_v18 }
  0xf0   :  { %314 = vsyncpa [#allocation4], 1 }
  0xf1   :  { %315 = vsyncpa [#allocation5], 1 }
  0xf2   :  { %316 = vsyncpa [#allocation7], 1 }

</bundles_post_ra>
